<compile_context>
chip_gen: v5e
topology: v5e:2x2
jax: 0.10.0
libtpu: 0.0.40
codegen_flags: <defaults>
</compile_context>

<pallas_src>
import functools

import jax
import jax.numpy as jnp
from jax.experimental import pallas as pl
from jax.experimental.pallas import tpu as pltpu


def _round_up(x, m):
    return (x + m - 1) // m * m


def _tpu_budget():
    """(physical VMEM bytes, #TensorCores) with conservative fallbacks."""
    vmem, cores = 64 << 20, 1                      # v7x-safe defaults
    try:
        info = pltpu.get_tpu_info()
        vmem = int(getattr(info, "vmem_capacity_bytes", vmem) or vmem)
        for name in ("num_cores", "num_tensorcores", "tensorcore_count"):
            val = getattr(info, name, None)
            if val:
                cores = int(val)
                break
    except Exception:                              # API drift / non-TPU backend
        pass
    return vmem, max(1, cores)


# -----------------------------------------------------------------------------
# Kernel 1: fused HadaWeight build (transposed, lane-padded, K-tiled).
#   weight^T[kblk] = ow^T[kblk] + (w1b^T[kblk] @ w1a^T) * (w2b^T[kblk] @ w2a^T) * scale
# -----------------------------------------------------------------------------
def _hada_weight_kernel(scale_ref, ow_t_ref, w1a_t_ref, w1b_t_ref,
                        w2a_t_ref, w2b_t_ref, wt_ref):
    scale = scale_ref[0]                                    # runtime SMEM scalar
    d1 = jnp.dot(w1b_t_ref[...], w1a_t_ref[...],
                 preferred_element_type=jnp.float32)        # (tk, Cout_pad)
    d2 = jnp.dot(w2b_t_ref[...], w2a_t_ref[...],
                 preferred_element_type=jnp.float32)
    wt = ow_t_ref[...].astype(jnp.float32) + d1 * d2 * scale
    wt_ref[...] = wt.astype(wt_ref.dtype)


def _build_hada_weight_t(ow_t, w1a_t, w1b_t, w2a_t, w2b_t, scale, *, compute_dtype):
    k_rows, cout_pad = ow_t.shape
    r = w1a_t.shape[0]
    # K tiling keeps per-step VMEM to a few MB at SD-scale K.
    tk = _round_up(k_rows, 8) if k_rows <= 1024 else 512
    k_pad = _round_up(k_rows, tk)
    if k_pad != k_rows:                 # zero rows -> zero delta rows, cropped below
        pad = k_pad - k_rows
        ow_t = jnp.pad(ow_t, ((0, pad), (0, 0)))
        w1b_t = jnp.pad(w1b_t, ((0, pad), (0, 0)))
        w2b_t = jnp.pad(w2b_t, ((0, pad), (0, 0)))
    scale_arr = jnp.asarray([scale], dtype=jnp.float32)

    wt = pl.pallas_call(
        _hada_weight_kernel,
        out_shape=jax.ShapeDtypeStruct((k_pad, cout_pad), compute_dtype),
        grid_spec=pltpu.PrefetchScalarGridSpec(
            num_scalar_prefetch=0,
            grid=(k_pad // tk,),
            in_specs=[
                pl.BlockSpec(memory_space=pltpu.MemorySpace.SMEM),  # scale
                pl.BlockSpec((tk, cout_pad), lambda i: (i, 0)),     # orig weight^T
                pl.BlockSpec((r, cout_pad), lambda i: (0, 0)),      # w1a^T (resident)
                pl.BlockSpec((tk, r), lambda i: (i, 0)),            # w1b^T
                pl.BlockSpec((r, cout_pad), lambda i: (0, 0)),      # w2a^T (resident)
                pl.BlockSpec((tk, r), lambda i: (i, 0)),            # w2b^T
            ],
            out_specs=pl.BlockSpec((tk, cout_pad), lambda i: (i, 0)),
        ),
        compiler_params=pltpu.CompilerParams(
            dimension_semantics=("parallel",)),
    )(scale_arr, ow_t, w1a_t, w1b_t, w2a_t, w2b_t)
    return wt[:k_rows] if k_pad != k_rows else wt


# -----------------------------------------------------------------------------
# Kernel 3: plain matmul + bias (weight VMEM-resident across M tiles).
# Only reached with small K (tiny-Cin conv / linear), so no K-reduction axis is
# needed here; the big-K conv case goes through the fused kernel below.
# -----------------------------------------------------------------------------
def _conv_matmul_kernel(p_ref, wt_ref, bias_ref, out_ref):
    acc = jnp.dot(p_ref[...], wt_ref[...], preferred_element_type=jnp.float32)
    out_ref[...] = (acc + bias_ref[...]).astype(out_ref.dtype)


def _matmul_bias(lhs, weight_t, bias2d, *, tile_m, compute_dtype, out_dtype,
                 vmem_phys, n_cores):
    m, k = lhs.shape
    cout_pad = weight_t.shape[1]
    cd = jnp.dtype(compute_dtype).itemsize
    ob = jnp.dtype(out_dtype).itemsize

    # Derive tile_m from the chip's VMEM capacity unless caller pinned it.
    if tile_m is None:
        budget = int(0.6 * vmem_phys)
        resident = 2 * k * cout_pad * cd + 2 * cout_pad * 4
        per_row = 2 * k * cd + 2 * cout_pad * ob
        tile_m = max(128, min(2048, (budget - resident) // max(per_row, 1)))
    tile = min(int(tile_m), _round_up(m, 16))
    tile = max(16, tile - tile % 16)                 # bf16 sublane packing
    if n_cores > 1:                                  # only 2-TC chips benefit
        while tile >= 512 and pl.cdiv(m, tile) < n_cores:
            tile //= 2
    while tile >= 256 and (_round_up(m, tile) - m) > 0.15 * m + 16:
        tile //= 2                                   # cap zero-row padding waste
    tile = max(16, tile - tile % 16)
    m_pad = _round_up(m, tile)
    if m_pad != m:
        lhs = jnp.pad(lhs, ((0, m_pad - m), (0, 0)))

    need = (2 * tile * k * cd + 2 * k * cout_pad * cd + 2 * cout_pad * 4
            + 2 * tile * cout_pad * ob)
    vmem_limit = int(min(max(need + (16 << 20), 32 << 20), 0.9 * vmem_phys))

    out = pl.pallas_call(
        _conv_matmul_kernel,
        out_shape=jax.ShapeDtypeStruct((m_pad, cout_pad), out_dtype),
        grid_spec=pltpu.PrefetchScalarGridSpec(
            num_scalar_prefetch=0,
            grid=(m_pad // tile,),
            in_specs=[
                pl.BlockSpec((tile, k), lambda i: (i, 0)),       # lhs (M-tiled)
                pl.BlockSpec((k, cout_pad), lambda i: (0, 0)),   # weight^T (resident)
                pl.BlockSpec((1, cout_pad), lambda i: (0, 0)),   # bias (resident)
            ],
            out_specs=pl.BlockSpec((tile, cout_pad), lambda i: (i, 0)),
        ),
        compiler_params=pltpu.CompilerParams(
            dimension_semantics=("parallel",),
            vmem_limit_bytes=vmem_limit),
    )(lhs, weight_t, bias2d)
    return out[:m]


# -----------------------------------------------------------------------------
# Kernel 2: im2col-FUSED conv (stride=1).  No materialized patches buffer.
# -----------------------------------------------------------------------------
def _fused_conv_kernel(x_ref, w_ref, bias_ref, out_ref, acc_ref, *, offsets, m2):
    # x_ref : (rows, Cin_p)  zero-padded NHWC image, W-flattened, compute dtype
    # w_ref : (taps, Cin_p, tile_n) HadaWeight (tap-major rows)
    # out   : (m2, tile_n);  acc: f32 VMEM scratch of the same shape
    acc_ref[...] = jnp.zeros_like(acc_ref) + bias_ref[...]
    for t, off in enumerate(offsets):                  # kh*kw static taps
        lhs = x_ref[pl.ds(off, m2), :]                 # shifted slab, no im2col
        acc_ref[...] += jnp.dot(lhs, w_ref[t],
                                preferred_element_type=jnp.float32)
    out_ref[...] = acc_ref[...].astype(out_ref.dtype)


def _loha_conv2d_fused(x, orig_weight, bias2d, w1a, w1b, w2a, w2b, *, scale,
                       padding, tile_n, compute_dtype, out_dtype,
                       cout_pad, vmem_phys):
    n, cin, h, w = x.shape
    cout, _, kh, kw = orig_weight.shape
    taps = kh * kw
    p = padding
    cin_p = _round_up(cin, 8)
    hp, wp = h + 2 * p, w + 2 * p
    ho, wo = hp - kh + 1, wp - kw + 1
    wc = _round_up(wp, 8)               # over-compute a few W columns; crop later
    m2 = ho * wc
    rows = (hp + 1) * wc                # +1 zero row guards tap-offset overshoot

    # ---- one-time weight build, tap-major row order (tap, cin) --------------
    ow = jnp.pad(
        jnp.transpose(orig_weight, (2, 3, 1, 0)).reshape(taps, cin, cout)
        .astype(compute_dtype),
        ((0, 0), (0, cin_p - cin), (0, cout_pad - cout)))
    ow_t = ow.reshape(taps * cin_p, cout_pad)

    def _reorder_b(wb):  # (r, K torch order) -> (taps*cin_p, r) f32
        r = wb.shape[0]
        wb3 = jnp.transpose(wb.reshape(r, cin, taps), (2, 1, 0)).astype(jnp.float32)
        wb3 = jnp.pad(wb3, ((0, 0), (0, cin_p - cin), (0, 0)))
        return wb3.reshape(taps * cin_p, r)

    w1a_t = jnp.pad(w1a.T.astype(jnp.float32), ((0, 0), (0, cout_pad - cout)))
    w2a_t = jnp.pad(w2a.T.astype(jnp.float32), ((0, 0), (0, cout_pad - cout)))
    weight_t = _build_hada_weight_t(ow_t, w1a_t, _reorder_b(w1b),
                                    w2a_t, _reorder_b(w2b),
                                    scale, compute_dtype=compute_dtype)
    w_taps = weight_t.reshape(taps, cin_p, cout_pad)

    # ---- input: NHWC, spatially zero-padded, W rounded to 8, flattened ------
    xh = jnp.transpose(x, (0, 2, 3, 1)).astype(compute_dtype)
    xf = jnp.pad(xh, ((0, 0), (p, p + 1), (p, wc - w - p), (0, cin_p - cin)))
    xf = xf.reshape(n, rows, cin_p)

    # Cout tiling bounds per-step VMEM (weight tile instead of full weight).
    if tile_n is None:
        tile_n = min(512, cout_pad)
    tile_n = min(_round_up(tile_n, 128), cout_pad)
    while cout_pad % tile_n:
        tile_n -= 128

    offsets = tuple(i * wc + j for i in range(kh) for j in range(kw))
    kernel = functools.partial(_fused_conv_kernel, offsets=offsets, m2=m2)

    cd = jnp.dtype(compute_dtype).itemsize
    ob = jnp.dtype(out_dtype).itemsize
    need = (2 * rows * cin_p * cd + 2 * taps * cin_p * tile_n * cd
            + 2 * tile_n * 4 + 2 * m2 * tile_n * ob + m2 * tile_n * 4)
    vmem_limit = int(min(max(need + (16 << 20), 32 << 20), 0.9 * vmem_phys))

    out = pl.pallas_call(
        kernel,
        out_shape=jax.ShapeDtypeStruct((n, m2, cout_pad), out_dtype),
        grid_spec=pltpu.PrefetchScalarGridSpec(
            num_scalar_prefetch=0,
            grid=(n, cout_pad // tile_n),
            in_specs=[
                pl.BlockSpec((None, rows, cin_p), lambda b, j: (b, 0, 0)),   # x (resident per n)
                pl.BlockSpec((taps, cin_p, tile_n), lambda b, j: (0, 0, j)),  # weight taps
                pl.BlockSpec((1, tile_n), lambda b, j: (0, j)),               # bias
            ],
            out_specs=pl.BlockSpec((None, m2, tile_n), lambda b, j: (b, 0, j)),
            scratch_shapes=[pltpu.VMEM((m2, tile_n), jnp.float32)],
        ),
        compiler_params=pltpu.CompilerParams(
            dimension_semantics=("parallel", "parallel"),
            vmem_limit_bytes=vmem_limit),
    )(xf, w_taps, bias2d)

    # (N, Ho*Wc, Cout_pad) -> crop the W over-compute and Cout padding -> NCHW.
    # TODO(synk): for very large images add an Ho-strip grid axis (manual halo
    # DMA) so the accumulator stays bounded; not needed at these sizes.
    out = out.reshape(n, ho, wc, cout_pad)[:, :, :wo, :cout]
    return jnp.transpose(out, (0, 3, 1, 2))


# -----------------------------------------------------------------------------
# Materialized-im2col path (tiny Cin or stride != 1) and the public wrappers.
# -----------------------------------------------------------------------------
def _im2col_nchw(x, kh, kw, stride, padding):
    """im2col matching torch weight.view(Cout, Cin*kh*kw) flattening order."""
    n, c, h, w = x.shape
    xp = jnp.pad(x, ((0, 0), (0, 0), (padding, padding), (padding, padding)))
    ho = (h + 2 * padding - kh) // stride + 1
    wo = (w + 2 * padding - kw) // stride + 1
    cols = []
    for i in range(kh):
        for j in range(kw):
            cols.append(xp[:, :, i:i + stride * ho:stride, j:j + stride * wo:stride])
    patches = jnp.stack(cols, axis=2).reshape(n, c * kh * kw, ho, wo)
    patches = patches.transpose(0, 2, 3, 1).reshape(n * ho * wo, c * kh * kw)
    return patches, ho, wo


def _loha_conv2d_im2col(x, orig_weight, bias2d, w1a, w1b, w2a, w2b, *, scale,
                        stride, padding, tile_m, compute_dtype, out_dtype,
                        cout_pad, vmem_phys, n_cores):
    n, cin, _, _ = x.shape
    cout, _, kh, kw = orig_weight.shape
    k = cin * kh * kw

    ow_t = jnp.pad(orig_weight.reshape(cout, k).T.astype(compute_dtype),
                   ((0, 0), (0, cout_pad - cout)))
    w1a_t = jnp.pad(w1a.T.astype(jnp.float32), ((0, 0), (0, cout_pad - cout)))
    w2a_t = jnp.pad(w2a.T.astype(jnp.float32), ((0, 0), (0, cout_pad - cout)))
    weight_t = _build_hada_weight_t(ow_t, w1a_t, w1b.T.astype(jnp.float32),
                                    w2a_t, w2b.T.astype(jnp.float32),
                                    scale, compute_dtype=compute_dtype)

    patches, ho, wo = _im2col_nchw(x.astype(compute_dtype), kh, kw, stride, padding)
    out = _matmul_bias(patches, weight_t, bias2d, tile_m=tile_m,
                       compute_dtype=compute_dtype, out_dtype=out_dtype,
                       vmem_phys=vmem_phys, n_cores=n_cores)
    out = out[:, :cout].reshape(n, ho, wo, cout)
    return jnp.transpose(out, (0, 3, 1, 2))


def loha_conv2d(x, orig_weight, bias, w1a, w1b, w2a, w2b, *, scale,
                stride=1, padding=1, tile_m=None, tile_n=None,
                compute_dtype=jnp.bfloat16, out_dtype=jnp.float32,
                fused_min_cin=32):
    """LohaModule.forward for a Conv2d org_module (dilation=1, groups=1)."""
    # TODO(synk): dilation != 1 / groups != 1 are not implemented.
    n, cin, _, _ = x.shape
    cout = orig_weight.shape[0]
    cout_pad = _round_up(cout, 128)            # lane-dense output / full MXU cols
    vmem_phys, n_cores = _tpu_budget()

    if bias is None:
        bias = jnp.zeros((cout,), jnp.float32)
    bias2d = jnp.pad(bias.astype(jnp.float32).reshape(1, cout),
                     ((0, 0), (0, cout_pad - cout)))

    if stride == 1 and cin >= fused_min_cin:
        return _loha_conv2d_fused(x, orig_weight, bias2d, w1a, w1b, w2a, w2b,
                                  scale=scale, padding=padding, tile_n=tile_n,
                                  compute_dtype=compute_dtype, out_dtype=out_dtype,
                                  cout_pad=cout_pad, vmem_phys=vmem_phys)
    return _loha_conv2d_im2col(x, orig_weight, bias2d, w1a, w1b, w2a, w2b,
                               scale=scale, stride=stride, padding=padding,
                               tile_m=tile_m, compute_dtype=compute_dtype,
                               out_dtype=out_dtype, cout_pad=cout_pad,
                               vmem_phys=vmem_phys, n_cores=n_cores)


def loha_linear(x, orig_weight, bias, w1a, w1b, w2a, w2b, *, scale,
                tile_m=None, compute_dtype=jnp.bfloat16, out_dtype=jnp.float32):
    """LohaModule.forward for a Linear org_module."""
    dout, din = orig_weight.shape
    cout_pad = _round_up(dout, 128)
    vmem_phys, n_cores = _tpu_budget()

    ow_t = jnp.pad(orig_weight.T.astype(compute_dtype),
                   ((0, 0), (0, cout_pad - dout)))
    w1a_t = jnp.pad(w1a.T.astype(jnp.float32), ((0, 0), (0, cout_pad - dout)))
    w2a_t = jnp.pad(w2a.T.astype(jnp.float32), ((0, 0), (0, cout_pad - dout)))
    weight_t = _build_hada_weight_t(ow_t, w1a_t, w1b.T.astype(jnp.float32),
                                    w2a_t, w2b.T.astype(jnp.float32),
                                    scale, compute_dtype=compute_dtype)
    if bias is None:
        bias = jnp.zeros((dout,), jnp.float32)
    bias2d = jnp.pad(bias.astype(jnp.float32).reshape(1, dout),
                     ((0, 0), (0, cout_pad - dout)))

    lead = x.shape[:-1]
    lhs = x.reshape(-1, din).astype(compute_dtype)
    out = _matmul_bias(lhs, weight_t, bias2d, tile_m=tile_m,
                       compute_dtype=compute_dtype, out_dtype=out_dtype,
                       vmem_phys=vmem_phys, n_cores=n_cores)
    return out[:, :dout].reshape(*lead, dout)


# -----------------------------------------------------------------------------
# Pure-JAX f32 references (mirror the PyTorch math) for in-script verification.
# -----------------------------------------------------------------------------
def _reference_conv(x, orig_weight, bias, w1a, w1b, w2a, w2b, *, scale, padding):
    cout, cin, kh, kw = orig_weight.shape
    d_w = (w1a @ w1b) * (w2a @ w2b) * scale
    weight = (orig_weight.reshape(cout, cin * kh * kw) + d_w).reshape(cout, cin, kh, kw)
    y = jax.lax.conv_general_dilated(
        x, weight, window_strides=(1, 1),
        padding=[(padding, padding), (padding, padding)],
        dimension_numbers=("NCHW", "OIHW", "NCHW"))
    return y + bias.reshape(1, cout, 1, 1)


if __name__ == "__main__":
    lora_dim, alpha, multiplier = 4, 1.0, 1.0
    scale = (alpha / lora_dim) * multiplier       # LohaModule scale * multiplier

    def hada_params(key, cout, k_cols):
        k1a, k1b, k2a, k2b = jax.random.split(key, 4)
        # torch init zeroes hada_w2_a (zero delta); use small values so the
        # Hadamard delta path is actually exercised.
        return (jax.random.normal(k1a, (cout, lora_dim), jnp.float32),
                jax.random.normal(k1b, (lora_dim, k_cols), jnp.float32),
                jax.random.normal(k2a, (cout, lora_dim), jnp.float32) * 0.05,
                jax.random.normal(k2b, (lora_dim, k_cols), jnp.float32) * 0.05)

    def check(got, want, name):
        assert got.shape == want.shape, (name, got.shape, want.shape)
        # bf16 matmul operands (f32 accumulation) vs f32 reference -> relaxed tol.
        assert jnp.allclose(got, want, atol=1e-1, rtol=5e-2), \
            f"{name}: max|err|={float(jnp.max(jnp.abs(got - want))):.4f}"

    # ---- test 1: tiny-Cin Conv2d (original demo config) -> im2col matmul path
    N, Cin, H, W, Cout, KH, KW = 2, 4, 16, 16, 8, 3, 3
    k1, k2, k3, kp = jax.random.split(jax.random.PRNGKey(0), 4)
    x = jax.random.normal(k1, (N, Cin, H, W), jnp.float32)
    ow = jax.random.normal(k2, (Cout, Cin, KH, KW), jnp.float32) * 0.1
    b = jax.random.normal(k3, (Cout,), jnp.float32) * 0.1
    w1a, w1b, w2a, w2b = hada_params(kp, Cout, Cin * KH * KW)
    y = jax.block_until_ready(
        loha_conv2d(x, ow, b, w1a, w1b, w2a, w2b, scale=scale, stride=1, padding=1))
    check(y, _reference_conv(x, ow, b, w1a, w1b, w2a, w2b, scale=scale, padding=1),
          "conv_im2col")

    # ---- test 2: wider-Cin Conv2d -> fused-im2col path (+ Cout grid axis) ----
    N2, Cin2, H2, W2, Cout2 = 2, 64, 16, 16, 256
    k1, k2, k3, kp = jax.random.split(jax.random.PRNGKey(1), 4)
    x2 = jax.random.normal(k1, (N2, Cin2, H2, W2), jnp.float32)
    ow2 = jax.random.normal(k2, (Cout2, Cin2, KH, KW), jnp.float32) * 0.1
    b2 = jax.random.normal(k3, (Cout2,), jnp.float32) * 0.1
    w1a2, w1b2, w2a2, w2b2 = hada_params(kp, Cout2, Cin2 * KH * KW)
    y2 = jax.block_until_ready(
        loha_conv2d(x2, ow2, b2, w1a2, w1b2, w2a2, w2b2, scale=scale,
                    stride=1, padding=1, tile_n=128))
    check(y2, _reference_conv(x2, ow2, b2, w1a2, w1b2, w2a2, w2b2,
                              scale=scale, padding=1), "conv_fused")

    # ---- test 3: Linear org_module ------------------------------------------
    B, Din, Dout = 8, 32, 16
    k1, k2, k3, kp = jax.random.split(jax.random.PRNGKey(2), 4)
    xl = jax.random.normal(k1, (B, Din), jnp.float32)
    owl = jax.random.normal(k2, (Dout, Din), jnp.float32) * 0.1
    bl = jax.random.normal(k3, (Dout,), jnp.float32) * 0.1
    w1al, w1bl, w2al, w2bl = hada_params(kp, Dout, Din)
    yl = jax.block_until_ready(
        loha_linear(xl, owl, bl, w1al, w1bl, w2al, w2bl, scale=scale))
    d_w = (w1al @ w1bl) * (w2al @ w2bl) * scale
    check(yl, xl @ (owl + d_w).T + bl, "linear")

    print("KERNEL_OK")
</pallas_src>

<mosaic_0001>
module attributes {stable_mosaic.version = 11 : i64} {
  func.func @_hada_weight_kernel(%arg0: i32, %arg1: memref<1xf32, #tpu.memory_space<smem>>, %arg2: memref<40x128xbf16, #tpu.memory_space<vmem>>, %arg3: memref<4x128xf32, #tpu.memory_space<vmem>>, %arg4: memref<40x4xf32, #tpu.memory_space<vmem>>, %arg5: memref<4x128xf32, #tpu.memory_space<vmem>>, %arg6: memref<40x4xf32, #tpu.memory_space<vmem>>, %arg7: memref<40x128xbf16, #tpu.memory_space<vmem>>) attributes {dimension_semantics = [#tpu.dimension_semantics<parallel>], iteration_bounds = array<i64: 1>, scalar_prefetch = 0 : i64, scratch_operands = 0 : i64, tpu.core_type = #tpu.core_type<tc>, window_params = [{transform_indices = @transform_0, window_bounds = array<i64: 1>}, {transform_indices = @transform_1, window_bounds = array<i64: 40, 128>}, {pipeline_mode = #tpu.pipeline_mode<synchronous>, transform_indices = @transform_2, window_bounds = array<i64: 4, 128>}, {transform_indices = @transform_3, window_bounds = array<i64: 40, 4>}, {pipeline_mode = #tpu.pipeline_mode<synchronous>, transform_indices = @transform_4, window_bounds = array<i64: 4, 128>}, {transform_indices = @transform_5, window_bounds = array<i64: 40, 4>}, {transform_indices = @transform_6, window_bounds = array<i64: 40, 128>}]} {
    %c0 = arith.constant 0 : index
    %0 = memref.load %arg1[%c0] : memref<1xf32, #tpu.memory_space<smem>>
    %c0_0 = arith.constant 0 : index
    %c0_1 = arith.constant 0 : index
    %1 = vector.load %arg4[%c0_0, %c0_1] : memref<40x4xf32, #tpu.memory_space<vmem>>, vector<40x4xf32>
    %c0_2 = arith.constant 0 : index
    %c0_3 = arith.constant 0 : index
    %2 = vector.load %arg3[%c0_2, %c0_3] : memref<4x128xf32, #tpu.memory_space<vmem>>, vector<4x128xf32>
    %cst = arith.constant dense<0.000000e+00> : vector<40x128xf32>
    %3 = tpu.matmul %1, %2, %cst {dimension_numbers = #tpu.dot_dimension_numbers<[1], [0], [0], [1], [0, 0, 1, 1], [], []>} : vector<40x4xf32>, vector<4x128xf32>, vector<40x128xf32> -> vector<40x128xf32>
    %c0_4 = arith.constant 0 : index
    %c0_5 = arith.constant 0 : index
    %4 = vector.load %arg6[%c0_4, %c0_5] : memref<40x4xf32, #tpu.memory_space<vmem>>, vector<40x4xf32>
    %c0_6 = arith.constant 0 : index
    %c0_7 = arith.constant 0 : index
    %5 = vector.load %arg5[%c0_6, %c0_7] : memref<4x128xf32, #tpu.memory_space<vmem>>, vector<4x128xf32>
    %cst_8 = arith.constant dense<0.000000e+00> : vector<40x128xf32>
    %6 = tpu.matmul %4, %5, %cst_8 {dimension_numbers = #tpu.dot_dimension_numbers<[1], [0], [0], [1], [0, 0, 1, 1], [], []>} : vector<40x4xf32>, vector<4x128xf32>, vector<40x128xf32> -> vector<40x128xf32>
    %c0_9 = arith.constant 0 : index
    %c0_10 = arith.constant 0 : index
    %7 = vector.load %arg2[%c0_9, %c0_10] : memref<40x128xbf16, #tpu.memory_space<vmem>>, vector<40x128xbf16>
    %8 = arith.extf %7 : vector<40x128xbf16> to vector<40x128xf32>
    %9 = arith.mulf %3, %6 : vector<40x128xf32>
    %10 = vector.broadcast %0 : f32 to vector<40x128xf32>
    %11 = arith.mulf %9, %10 : vector<40x128xf32>
    %12 = arith.addf %8, %11 : vector<40x128xf32>
    %13 = arith.truncf %12 : vector<40x128xf32> to vector<40x128xbf16>
    %c0_11 = arith.constant 0 : index
    %c0_12 = arith.constant 0 : index
    %14 = vector.load %arg7[%c0_11, %c0_12] : memref<40x128xbf16, #tpu.memory_space<vmem>>, vector<40x128xbf16>
    tpu.vector_store %arg7[%c0_11, %c0_12], %13 {strides = array<i32>} : memref<40x128xbf16, #tpu.memory_space<vmem>>, vector<40x128xbf16>,
    return
  }
  func.func @transform_0(%arg0: i32) -> i32 {
    %c0_i32 = arith.constant 0 : i32
    %c0_i32_0 = arith.constant 0 : i32
    return %c0_i32 : i32
  }
  func.func @transform_1(%arg0: i32) -> (i32, i32) {
    %c0_i32 = arith.constant 0 : i32
    %c0_i32_0 = arith.constant 0 : i32
    return %arg0, %c0_i32 : i32, i32
  }
  func.func @transform_2(%arg0: i32) -> (i32, i32) {
    %c0_i32 = arith.constant 0 : i32
    %c0_i32_0 = arith.constant 0 : i32
    %c0_i32_1 = arith.constant 0 : i32
    return %c0_i32, %c0_i32_0 : i32, i32
  }
  func.func @transform_3(%arg0: i32) -> (i32, i32) {
    %c0_i32 = arith.constant 0 : i32
    %c0_i32_0 = arith.constant 0 : i32
    return %arg0, %c0_i32 : i32, i32
  }
  func.func @transform_4(%arg0: i32) -> (i32, i32) {
    %c0_i32 = arith.constant 0 : i32
    %c0_i32_0 = arith.constant 0 : i32
    %c0_i32_1 = arith.constant 0 : i32
    return %c0_i32, %c0_i32_0 : i32, i32
  }
  func.func @transform_5(%arg0: i32) -> (i32, i32) {
    %c0_i32 = arith.constant 0 : i32
    %c0_i32_0 = arith.constant 0 : i32
    return %arg0, %c0_i32 : i32, i32
  }
  func.func @transform_6(%arg0: i32) -> (i32, i32) {
    %c0_i32 = arith.constant 0 : i32
    %c0_i32_0 = arith.constant 0 : i32
    return %arg0, %c0_i32 : i32, i32
  }
}

</mosaic_0001>

<bundles_post_ra>
// kernel: tpu_custom_call.1
= control target key start
LH: loop header
LB: loop body
LE: loop exit
PB: predicated region body
PF: predicated region fallthrough
CT: control target
= control target key end

     0   :  { %vm48_vm0 = vcmask 1043456   ;;  %vm32_vm1 = vcmask 31744   ;;  %s356_s0 = inlined_call_operand.<no memory space> [shape: f32[1], index: 0, kind: input, shape index: {}]   ;;  %s357_s1 = inlined_call_operand.vmem [shape: bf16[40,128], index: 1, kind: input, shape index: {}]   ;;  %s358_s2 = inlined_call_operand.vmem [shape: f32[4,128], index: 2, kind: input, shape index: {}]   ;;  %s359_s3 = inlined_call_operand.vmem [shape: f32[40,4], index: 3, kind: input, shape index: {}]   ;;  %s360_s4 = inlined_call_operand.vmem [shape: f32[4,128], index: 4, kind: input, shape index: {}]   ;;  %s361_s5 = inlined_call_operand.vmem [shape: f32[40,4], index: 5, kind: input, shape index: {}]   ;;  %s362_s6 = inlined_call_operand.hbm [shape: bf16[40,128], index: 6, kind: output, shape index: {}]  }
   0x1   :  { %v31_v0 = vld [vmem:[%s358_s2] sm:$0xf]  ;;  %v29_v4 = vld [vmem:[%s359_s3 + $0x18] sm:$0xff] }
   0x2   :  { %v89_v1 = vld [vmem:[%s360_s4] sm:$0xf]  ;;  %194 = vmatpush.msk.msra.mxu0 %vm48_vm0, %v31_v0  ;;  %v87_v5 = vld [vmem:[%s361_s5 + $0x18] sm:$0xff]  ;;  %226 = vmatpush.msk.msra.mxu2 %vm48_vm0, %v31_v0 }
   0x3   :  { %v26_v2 = vld [vmem:[%s359_s3] sm:$0xff]  ;;  %200 = vmatpush.msk.msra.mxu1 %vm48_vm0, %v89_v1  ;;  %227 = vmatpush.msk.msra.mxu3 %vm48_vm0, %v89_v1 }
   0x4   :  { %v84_v3 = vld [vmem:[%s361_s5] sm:$0xff]  ;;  %195 = vmatmul.msk.f32.vlgmr.msra.gmra.mxu0 %vm32_vm1, %v26_v2  ;;  %198 = vmatmul.msk.f32.vlgmr.msra.gmra.mxu2 %vm32_vm1, %v29_v4 }
   0x5   :  { %201 = vmatmul.msk.f32.vlgmr.msra.gmra.mxu1 %vm32_vm1, %v84_v3  ;;  %204 = vmatmul.msk.f32.vlgmr.msra.gmra.mxu3 %vm32_vm1, %v87_v5 }
   0x6   :  { %12 = vsyncpa [#allocation4], 0  ;;  %v27_v6 = vld [vmem:[%s359_s3 + $0x8] sm:$0xff]  ;;  %v30_v8 = vld [vmem:[%s359_s3 + $0x20] sm:$0xff]  ;;  %v155_v16 = vstv %s356_s0  ;;  %s257_s0 = smov [#allocation3]   ;;  %s258_s28 = smov 64  }
   0x7   :  { %v85_v7 = vld [vmem:[%s361_s5 + $0x8] sm:$0xff]  ;;  %v88_v9 = vld [vmem:[%s361_s5 + $0x20] sm:$0xff]  ;;  %v28_v10 = vld [vmem:[%s359_s3 + $0x10] sm:$0xff]  ;;  %s180_s25 = sshll.u32 %s257_s0, 4  ;;  %s259_s29 = smov 4   ;;  %s181_s25 = int_to_ptr.vmem [resolvable:$true] %s180_s25 }
   0x8   :  { %v86_v11 = vld [vmem:[%s361_s5 + $0x10] sm:$0xff]  ;;  %v207_v15 = vld [vmem:[%s357_s1] sm:$0xff]   ;;  %v224_v28 = vld [vmem:[%s357_s1 + $0x8] sm:$0xff]  }
   0x9   :  { %v208_v21 = vunpack.c.l.bf16 %v207_v15  ;;  %v209_v23 = vunpack.c.h.bf16 %v207_v15  ;;  %v144_v30 = vld [vmem:[%s357_s1 + $0x10] sm:$0xf]  ;;  %v213_v34 = vunpack.c.h.bf16 %v224_v28  ;;  %v212_v36 = vunpack.c.l.bf16 %v224_v28  ;;  %s182_s1 = sshll.u32 %s362_s6, 4  ;;  %s183_s1 = int_to_ptr.hbm [resolvable:$true] %s182_s1 }
   0xa   :  { %v149_v40 = vunpack.c.l.bf16 %v144_v30 }
   0xc   :  { %196 = vmatmul.msk.f32.gmra.mxu0 %vm32_vm1, %v27_v6  ;;  %199 = vmatmul.msk.f32.gmra.mxu2 %vm32_vm1, %v30_v8 }
   0xd   :  { %202 = vmatmul.msk.f32.gmra.mxu1 %vm32_vm1, %v85_v7  ;;  %205 = vmatmul.msk.f32.gmra.mxu3 %vm32_vm1, %v88_v9 }
  0x14   :  { %197 = vmatmul.msk.f32.gmra.mxu0 %vm32_vm1, %v28_v10 }
  0x15   :  { %203 = vmatmul.msk.f32.gmra.mxu1 %vm32_vm1, %v86_v11 }
  0x81   :  { %v69_v12 = vpop.f32.mrf.mxu0 }
  0x82   :  { %v125_v13 = vpop.f32.mrf.mxu1 }
  0x83   :  { %v150_v14 = vmul.f32 %v125_v13, %v69_v12 }
  0x85   :  { %v156_v22 = vmul.f32 %v155_v16, %v150_v14 }
  0x87   :  { %v78_v18 = vpop.f32.mrf.mxu2  ;;  %v161_v26 = vadd.f32 %v208_v21, %v156_v22 }
  0x88   :  { %v134_v20 = vpop.f32.mrf.mxu3 }
  0x89   :  { %v72_v17 = vpop.f32.mrf.mxu0  ;;  %v153_v29 = vmul.f32 %v134_v20, %v78_v18 }
  0x8a   :  { %v128_v19 = vpop.f32.mrf.mxu1 }
  0x8b   :  { %v151_v24 = vmul.f32 %v128_v19, %v72_v17  ;;  %v159_v38 = vmul.f32 %v155_v16, %v153_v29 }
  0x8d   :  { %v157_v25 = vmul.f32 %v155_v16, %v151_v24  ;;  %v164_v44 = vadd.f32 %v213_v34, %v159_v38 }
  0x8f   :  { %v162_v27 = vadd.f32 %v209_v23, %v157_v25  ;;  %v81_v33 = vpop.f32.mrf.mxu2 }
  0x90   :  { %v137_v37 = vpop.f32.mrf.mxu3 }
  0x91   :  { %v217_v31 = vpack.c.bf16 %v162_v27, %v161_v26  ;;  %v75_v32 = vpop.f32.mrf.mxu0  ;;  %v154_v41 = vmul.f32 %v137_v37, %v81_v33 }
  0x92   :  { %v131_v35 = vpop.f32.mrf.mxu1 }
  0x93   :  { %218 = vst [vmem:[#allocation3] sm:$0xff] %v217_v31   ;;  %v152_v39 = vmul.f32 %v131_v35, %v75_v32  ;;  %v160_v43 = vmul.f32 %v155_v16, %v154_v41 }
  0x95   :  { %v158_v42 = vmul.f32 %v155_v16, %v152_v39  ;;  %v165_v46 = vadd.f32 %v160_v43, %v149_v40 }
  0x97   :  { %v163_v45 = vadd.f32 %v212_v36, %v158_v42  ;;  %v170_v48 = vpack.c.bf16 %v165_v46, %v165_v46 }
  0x99   :  { %v222_v47 = vpack.c.bf16 %v164_v44, %v163_v45  ;;  %175 = vst [vmem:[#allocation3 + $0x10] sm:$0xf] %v170_v48 }
  0x9b   :  { %225 = vst [vmem:[#allocation3 + $0x8] sm:$0xff] %v222_v47  }
  0x9c   :  { %188 = dma.vmem_to_hbm [thread:$0]  %s181_s25, 320, %s183_s1, [#allocation4], %s258_s28, %s258_s28, %s259_s29  }
  0x9d   :  { %255 = dma.done.wait [#allocation4], 320  }
  0x9e   :  { %256 = vsyncadd [#allocation4], 4294966976 }
  0x9f   :  { %193 = vsyncpa [#allocation4], 1 }

</bundles_post_ra>
